<compile_context>
chip_gen: v5e
topology: v5e:2x2
jax: 0.10.0
libtpu: 0.0.40
codegen_flags: <defaults>
</compile_context>

<pallas_src>
import math
import functools

import jax
import jax.numpy as jnp
from jax import lax
from jax.experimental import pallas as pl
from jax.experimental.pallas import tpu as pltpu


# ----------------------------- Pallas kernel ---------------------------------

def _layer_norm(x, gamma, beta, eps=1e-12):
    # One-pass mean/variance + EUP rsqrt: saves a full-slab VPU pass per LN and
    # moves the divide off the VALU.  All LN math stays in f32.
    mu = jnp.mean(x, axis=-1, keepdims=True)
    var = jnp.maximum(jnp.mean(x * x, axis=-1, keepdims=True) - mu * mu, 0.0)
    return (x - mu) * lax.rsqrt(var + eps) * gamma + beta


def transformer_block_kernel(
    # inputs
    mask_ref, x_ref,
    wqkv_ref, bqkv_ref, wo_ref, bo_ref, ln1_g_ref, ln1_b_ref,
    w1_ref, b1_ref, w2_ref, b2_ref, ln2_g_ref, ln2_b_ref,
    # output (doubles as the VMEM-resident hidden state across layers)
    out_ref,
    *, n_heads, activation, compute_dtype,
):
    layer = pl.program_id(1)

    # Load this batch element's embeddings into the resident hidden state once.
    @pl.when(layer == 0)
    def _():
        out_ref[...] = x_ref[...].astype(out_ref.dtype)

    h = out_ref[0]                              # (S, D) f32, resident in VMEM
    S, D = h.shape
    dh = D // n_heads
    scale = 1.0 / math.sqrt(dh)

    def mm(a, b):
        return jnp.dot(a.astype(compute_dtype), b.astype(compute_dtype),
                       preferred_element_type=jnp.float32)

    def mm_nt(a, b):
        # a @ b^T expressed via dimension numbers — the MXU consumes the
        # transposed operand natively, no XLU transpose is materialized.
        return lax.dot_general(
            a.astype(compute_dtype), b.astype(compute_dtype),
            dimension_numbers=(((1,), (1,)), ((), ())),
            preferred_element_type=jnp.float32)

    # Additive key-padding bias rebuilt in-kernel from the (1, S) mask vector.
    # Broadcasts over query rows; no (bs*S, bs*S) bias is ever materialized.
    bias = jnp.where(mask_ref[0] != 0.0, jnp.float32(0.0), jnp.float32(-1e9))

    # ---- fused Q|K|V projection: one full-K, lane-dense MXU matmul ----
    qkv = mm(h, wqkv_ref[0]) + bqkv_ref[0]      # (S, 3D)

    wo = wo_ref[0]                              # (D, D)

    # ---- per-head scaled dot-product attention ----
    # Each head's (S, dh) context is immediately projected by the matching
    # (dh, D) row-slice of W_o and accumulated: no lane-slice stores, no ctx
    # scratch, no concatenate.  Attention dropout is identity (inference).
    sa = jnp.zeros((S, D), jnp.float32)
    for hd in range(n_heads):
        lo = hd * dh
        qh = qkv[:, lo:lo + dh] * scale                 # (S, dh)
        kh = qkv[:, D + lo:D + lo + dh]                 # (S, dh)
        vh = qkv[:, 2 * D + lo:2 * D + lo + dh]         # (S, dh)
        s = mm_nt(qh, kh) + bias                        # (S, S)
        s = s - jnp.max(s, axis=-1, keepdims=True)
        p = jnp.exp(s)
        p = p * pl.reciprocal(jnp.sum(p, axis=-1, keepdims=True), approx=True)
        sa = sa + mm(mm(p, vh), wo[lo:lo + dh, :])      # (S, D) lane-dense acc

    sa = sa + bo_ref[0]
    sa = _layer_norm(sa + h, ln1_g_ref[0], ln1_b_ref[0])

    # ---- FFN (lin1 -> activation -> lin2) + residual + LayerNorm ----
    h1 = mm(sa, w1_ref[0]) + b1_ref[0]
    if activation == "relu":
        h1 = jnp.maximum(h1, 0.0)
    else:  # 'gelu' — erf form, matching DistilBERT's gelu
        h1 = 0.5 * h1 * (1.0 + lax.erf(h1 * (1.0 / math.sqrt(2.0))))
    h2 = mm(h1, w2_ref[0]) + b2_ref[0]
    # FFN dropout is identity in inference.
    out_ref[0] = _layer_norm(h2 + sa, ln2_g_ref[0], ln2_b_ref[0]).astype(out_ref.dtype)


# ------------------------------ JAX wrapper -----------------------------------

def stack_layer_params(layer_params, weight_dtype=jnp.float32):
    """Stack per-layer params along a leading layer axis; fuse Q|K|V.

    Pass weight_dtype=jnp.bfloat16 on v6e/v7x to halve weight HBM traffic and
    the double-buffered weight VMEM footprint (accumulation stays f32).
    """
    def c(a):
        return a.astype(weight_dtype)

    stacked = {
        "wqkv": jnp.stack([c(jnp.concatenate([p["wq"], p["wk"], p["wv"]], axis=-1))
                           for p in layer_params]),
        "bqkv": jnp.stack([c(jnp.concatenate([p["bq"], p["bk"], p["bv"]], axis=-1))
                           for p in layer_params]),
    }
    for name in ["wo", "bo", "ln1_g", "ln1_b",
                 "w1", "b1", "w2", "b2", "ln2_g", "ln2_b"]:
        stacked[name] = jnp.stack([c(p[name]) for p in layer_params])
    return stacked


def transformer_forward(x, attn_mask, stacked, *, n_heads, activation="relu",
                        compute_dtype=jnp.float32):
    """Transformer.forward (all n_layers) in a single pallas_call.

    x: (bs, S, D) f32, attn_mask: (bs, S) (1 = keep, 0 = masked key).
    """
    bs, S, D = x.shape
    assert D % n_heads == 0
    L = stacked["wqkv"].shape[0]

    # tiny per-batch mask vector; (bs, 1, S) so the block equals the full
    # trailing dims (no (8,128) tiling issue at small S).
    mask3 = attn_mask.reshape(bs, 1, S).astype(jnp.float32)

    names = ["wqkv", "bqkv", "wo", "bo", "ln1_g", "ln1_b",
             "w1", "b1", "w2", "b2", "ln2_g", "ln2_b"]
    weights = [stacked[n] for n in names]

    def batch_spec(a):       # indexed by batch, constant over layers
        return pl.BlockSpec((1,) + tuple(a.shape[1:]), lambda b, l: (b, 0, 0))

    def layer_spec(a):       # one layer's weights per grid step (pipelined DMA)
        return pl.BlockSpec((1,) + tuple(a.shape[1:]), lambda b, l: (l, 0, 0))

    in_specs = [batch_spec(mask3), batch_spec(x)] + [layer_spec(w) for w in weights]
    # Output block index depends only on batch -> stays resident in VMEM across
    # the inner layer axis and acts as the hidden-state accumulator.
    out_specs = pl.BlockSpec((1, S, D), lambda b, l: (b, 0, 0))

    kernel = functools.partial(
        transformer_block_kernel,
        n_heads=n_heads, activation=activation, compute_dtype=compute_dtype)

    out = pl.pallas_call(
        kernel,
        out_shape=jax.ShapeDtypeStruct((bs, S, D), jnp.float32),
        grid=(bs, L),
        in_specs=in_specs,
        out_specs=out_specs,
        compiler_params=pltpu.CompilerParams(
            dimension_semantics=("parallel", "arbitrary")),
    )(mask3, x, *weights)

    # TODO(synk): output_attentions / output_hidden_states / head_mask variants
    # of Transformer.forward are not materialized (inference fast-path only).
    return out


# --------------------------- pure-JAX reference --------------------------------

def _ref_block(x, mask, p, n_heads):
    bs, S, D = x.shape
    dh = D // n_heads

    def lin(a, w, b):
        return a @ w + b

    q = lin(x, p["wq"], p["bq"]).reshape(bs, S, n_heads, dh).transpose(0, 2, 1, 3)
    k = lin(x, p["wk"], p["bk"]).reshape(bs, S, n_heads, dh).transpose(0, 2, 1, 3)
    v = lin(x, p["wv"], p["bv"]).reshape(bs, S, n_heads, dh).transpose(0, 2, 1, 3)
    q = q / math.sqrt(dh)
    scores = jnp.einsum("bhqd,bhkd->bhqk", q, k)
    neg = jnp.where(mask[:, None, None, :] == 0.0, -jnp.inf, 0.0)
    scores = scores + neg
    w = jax.nn.softmax(scores, axis=-1)
    ctx = jnp.einsum("bhqk,bhkd->bhqd", w, v).transpose(0, 2, 1, 3).reshape(bs, S, D)
    sa = lin(ctx, p["wo"], p["bo"])

    def ln(a, g, b_):
        mu = a.mean(-1, keepdims=True)
        var = ((a - mu) ** 2).mean(-1, keepdims=True)
        return (a - mu) / jnp.sqrt(var + 1e-12) * g + b_

    sa = ln(sa + x, p["ln1_g"], p["ln1_b"])
    h = jnp.maximum(lin(sa, p["w1"], p["b1"]), 0.0)
    h = lin(h, p["w2"], p["b2"])
    return ln(h + sa, p["ln2_g"], p["ln2_b"])


def _ref_transformer(x, mask, layer_params, n_heads):
    for p in layer_params:
        x = _ref_block(x, mask, p, n_heads)
    return x


# ----------------------------------- main ---------------------------------------

if __name__ == "__main__":
    # config: dim=32, hidden_dim=64, n_heads=4, n_layers=2, activation='relu',
    #         dropout=0 (inference)
    BS, SEQ, DIM, HID, HEADS, LAYERS = 2, 8, 32, 64, 4, 2

    key = jax.random.PRNGKey(0)

    def init_layer(k):
        ks = jax.random.split(k, 8)
        s = 0.02
        # Weights created directly in (in, out) orientation (see NOTE above).
        return {
            "wq": jax.random.normal(ks[0], (DIM, DIM), jnp.float32) * s,
            "bq": jax.random.normal(ks[1], (1, DIM), jnp.float32) * s,
            "wk": jax.random.normal(ks[2], (DIM, DIM), jnp.float32) * s,
            "bk": jnp.zeros((1, DIM), jnp.float32),
            "wv": jax.random.normal(ks[3], (DIM, DIM), jnp.float32) * s,
            "bv": jnp.zeros((1, DIM), jnp.float32),
            "wo": jax.random.normal(ks[4], (DIM, DIM), jnp.float32) * s,
            "bo": jax.random.normal(ks[5], (1, DIM), jnp.float32) * s,
            "ln1_g": jnp.ones((1, DIM), jnp.float32),
            "ln1_b": jnp.zeros((1, DIM), jnp.float32),
            "w1": jax.random.normal(ks[6], (DIM, HID), jnp.float32) * s,
            "b1": jnp.zeros((1, HID), jnp.float32),
            "w2": jax.random.normal(ks[7], (HID, DIM), jnp.float32) * s,
            "b2": jnp.zeros((1, DIM), jnp.float32),
            "ln2_g": jnp.ones((1, DIM), jnp.float32),
            "ln2_b": jnp.zeros((1, DIM), jnp.float32),
        }

    key, kx, *layer_keys = jax.random.split(key, 2 + LAYERS)
    params = [init_layer(k) for k in layer_keys]
    stacked = stack_layer_params(params)           # f32 demo; bf16 on v6e/v7x

    x = jax.random.normal(kx, (BS, SEQ, DIM), jnp.float32)
    attn_mask = jnp.ones((BS, SEQ), jnp.float32)
    attn_mask = attn_mask.at[1, -2:].set(0.0)      # mask last two keys of batch 1

    out = transformer_forward(x, attn_mask, stacked, n_heads=HEADS,
                              activation="relu", compute_dtype=jnp.float32)
    out = jax.block_until_ready(out)

    ref = _ref_transformer(x, attn_mask, params, HEADS)
    assert out.shape == (BS, SEQ, DIM)
    # Tolerance covers the EUP approximate reciprocal used in the softmax;
    # structural errors would be O(1).
    assert bool(jnp.allclose(out, ref, atol=2e-2, rtol=2e-2)), "mismatch vs reference"

    print("KERNEL_OK")
</pallas_src>

<mosaic_0001>
module attributes {stable_mosaic.version = 11 : i64} {
  func.func @transformer_block_kernel(%arg0: i32, %arg1: i32, %arg2: memref<1x1x8xf32, #tpu.memory_space<vmem>>, %arg3: memref<1x8x32xf32, #tpu.memory_space<vmem>>, %arg4: memref<1x32x96xf32, #tpu.memory_space<vmem>>, %arg5: memref<1x1x96xf32, #tpu.memory_space<vmem>>, %arg6: memref<1x32x32xf32, #tpu.memory_space<vmem>>, %arg7: memref<1x1x32xf32, #tpu.memory_space<vmem>>, %arg8: memref<1x1x32xf32, #tpu.memory_space<vmem>>, %arg9: memref<1x1x32xf32, #tpu.memory_space<vmem>>, %arg10: memref<1x32x64xf32, #tpu.memory_space<vmem>>, %arg11: memref<1x1x64xf32, #tpu.memory_space<vmem>>, %arg12: memref<1x64x32xf32, #tpu.memory_space<vmem>>, %arg13: memref<1x1x32xf32, #tpu.memory_space<vmem>>, %arg14: memref<1x1x32xf32, #tpu.memory_space<vmem>>, %arg15: memref<1x1x32xf32, #tpu.memory_space<vmem>>, %arg16: memref<1x8x32xf32, #tpu.memory_space<vmem>>) attributes {dimension_semantics = [#tpu.dimension_semantics<parallel>, #tpu.dimension_semantics<arbitrary>], iteration_bounds = array<i64: 2, 2>, scalar_prefetch = 0 : i64, scratch_operands = 0 : i64, tpu.core_type = #tpu.core_type<tc>, window_params = [{transform_indices = @transform_0, window_bounds = array<i64: 1, 1, 8>}, {transform_indices = @transform_1, window_bounds = array<i64: 1, 8, 32>}, {transform_indices = @transform_2, window_bounds = array<i64: 1, 32, 96>}, {transform_indices = @transform_3, window_bounds = array<i64: 1, 1, 96>}, {transform_indices = @transform_4, window_bounds = array<i64: 1, 32, 32>}, {transform_indices = @transform_5, window_bounds = array<i64: 1, 1, 32>}, {transform_indices = @transform_6, window_bounds = array<i64: 1, 1, 32>}, {transform_indices = @transform_7, window_bounds = array<i64: 1, 1, 32>}, {transform_indices = @transform_8, window_bounds = array<i64: 1, 32, 64>}, {transform_indices = @transform_9, window_bounds = array<i64: 1, 1, 64>}, {transform_indices = @transform_10, window_bounds = array<i64: 1, 64, 32>}, {transform_indices = @transform_11, window_bounds = array<i64: 1, 1, 32>}, {transform_indices = @transform_12, window_bounds = array<i64: 1, 1, 32>}, {transform_indices = @transform_13, window_bounds = array<i64: 1, 1, 32>}, {transform_indices = @transform_14, window_bounds = array<i64: 1, 8, 32>}]} {
    %c0_i32 = arith.constant 0 : i32
    %0 = arith.cmpi eq, %arg1, %c0_i32 : i32
    %1 = arith.extui %0 : i1 to i32
    %c0_i32_0 = arith.constant 0 : i32
    %2 = arith.cmpi ne, %1, %c0_i32_0 : i32
    scf.if %2 {
      %c0_88 = arith.constant 0 : index
      %c0_89 = arith.constant 0 : index
      %c0_90 = arith.constant 0 : index
      %191 = vector.load %arg3[%c0_88, %c0_89, %c0_90] : memref<1x8x32xf32, #tpu.memory_space<vmem>>, vector<1x8x32xf32>
      %c0_91 = arith.constant 0 : index
      %c0_92 = arith.constant 0 : index
      %c0_93 = arith.constant 0 : index
      %192 = vector.load %arg16[%c0_91, %c0_92, %c0_93] : memref<1x8x32xf32, #tpu.memory_space<vmem>>, vector<1x8x32xf32>
      tpu.vector_store %arg16[%c0_91, %c0_92, %c0_93], %191 {strides = array<i32>} : memref<1x8x32xf32, #tpu.memory_space<vmem>>, vector<1x8x32xf32>,
    } else {
    }
    %c0 = arith.constant 0 : index
    %c0_1 = arith.constant 0 : index
    %c0_2 = arith.constant 0 : index
    %3 = vector.load %arg16[%c0, %c0_1, %c0_2] : memref<1x8x32xf32, #tpu.memory_space<vmem>>, vector<1x8x32xf32>
    %4 = vector.shape_cast %3 : vector<1x8x32xf32> to vector<8x32xf32>
    %c0_3 = arith.constant 0 : index
    %c0_4 = arith.constant 0 : index
    %c0_5 = arith.constant 0 : index
    %5 = vector.load %arg2[%c0_3, %c0_4, %c0_5] : memref<1x1x8xf32, #tpu.memory_space<vmem>>, vector<1x1x8xf32>
    %6 = vector.shape_cast %5 : vector<1x1x8xf32> to vector<1x8xf32>
    %cst = arith.constant 0.000000e+00 : f32
    %7 = vector.broadcast %cst : f32 to vector<1x8xf32>
    %8 = arith.cmpf one, %6, %7 : vector<1x8xf32>
    %cst_6 = arith.constant 0.000000e+00 : f32
    %cst_7 = arith.constant -1.000000e+09 : f32
    %9 = vector.broadcast %cst_6 : f32 to vector<1x8xf32>
    %10 = vector.broadcast %cst_7 : f32 to vector<1x8xf32>
    %11 = arith.select %8, %9, %10 : vector<1x8xi1>, vector<1x8xf32>
    %c0_8 = arith.constant 0 : index
    %c0_9 = arith.constant 0 : index
    %c0_10 = arith.constant 0 : index
    %12 = vector.load %arg4[%c0_8, %c0_9, %c0_10] : memref<1x32x96xf32, #tpu.memory_space<vmem>>, vector<1x32x96xf32>
    %13 = vector.shape_cast %12 : vector<1x32x96xf32> to vector<32x96xf32>
    %cst_11 = arith.constant dense<0.000000e+00> : vector<8x96xf32>
    %14 = tpu.matmul %4, %13, %cst_11 {dimension_numbers = #tpu.dot_dimension_numbers<[1], [0], [0], [1], [0, 0, 1, 1], [], []>} : vector<8x32xf32>, vector<32x96xf32>, vector<8x96xf32> -> vector<8x96xf32>
    %c0_12 = arith.constant 0 : index
    %c0_13 = arith.constant 0 : index
    %c0_14 = arith.constant 0 : index
    %15 = vector.load %arg5[%c0_12, %c0_13, %c0_14] : memref<1x1x96xf32, #tpu.memory_space<vmem>>, vector<1x1x96xf32>
    %16 = vector.shape_cast %15 : vector<1x1x96xf32> to vector<1x96xf32>
    %17 = vector.broadcast %16 : vector<1x96xf32> to vector<8x96xf32>
    %18 = arith.addf %14, %17 : vector<8x96xf32>
    %c0_15 = arith.constant 0 : index
    %c0_16 = arith.constant 0 : index
    %c0_17 = arith.constant 0 : index
    %19 = vector.load %arg6[%c0_15, %c0_16, %c0_17] : memref<1x32x32xf32, #tpu.memory_space<vmem>>, vector<1x32x32xf32>
    %20 = vector.shape_cast %19 : vector<1x32x32xf32> to vector<32x32xf32>
    %cst_18 = arith.constant 0.000000e+00 : f32
    %21 = vector.broadcast %cst_18 : f32 to vector<8x32xf32>
    %22 = vector.extract_strided_slice %18 {offsets = [0, 0], sizes = [8, 8], strides = [1, 1]} : vector<8x96xf32> to vector<8x8xf32>
    %cst_19 = arith.constant 0.353553385 : f32
    %23 = vector.broadcast %cst_19 : f32 to vector<8x8xf32>
    %24 = arith.mulf %22, %23 : vector<8x8xf32>
    %25 = vector.extract_strided_slice %18 {offsets = [0, 32], sizes = [8, 8], strides = [1, 1]} : vector<8x96xf32> to vector<8x8xf32>
    %26 = vector.extract_strided_slice %18 {offsets = [0, 64], sizes = [8, 8], strides = [1, 1]} : vector<8x96xf32> to vector<8x8xf32>
    %cst_20 = arith.constant dense<0.000000e+00> : vector<8x8xf32>
    %27 = tpu.matmul %24, %25, %cst_20 {dimension_numbers = #tpu.dot_dimension_numbers<[1], [1], [0], [0], [0, 0, 1, 0], [], []>} : vector<8x8xf32>, vector<8x8xf32>, vector<8x8xf32> -> vector<8x8xf32>
    %28 = vector.broadcast %11 : vector<1x8xf32> to vector<8x8xf32>
    %29 = arith.addf %27, %28 : vector<8x8xf32>
    %cst_21 = arith.constant dense<0xFF800000> : vector<8xf32>
    %30 = vector.multi_reduction <maximumf>, %29, %cst_21 [1] : vector<8x8xf32> to vector<8xf32>
    %31 = vector.shape_cast %30 : vector<8xf32> to vector<8x1xf32>
    %32 = vector.broadcast %31 : vector<8x1xf32> to vector<8x8xf32>
    %33 = arith.subf %29, %32 : vector<8x8xf32>
    %34 = math.exp %33 : vector<8x8xf32>
    %cst_22 = arith.constant dense<0.000000e+00> : vector<8xf32>
    %35 = vector.multi_reduction <add>, %34, %cst_22 [1] : vector<8x8xf32> to vector<8xf32>
    %36 = vector.shape_cast %35 : vector<8xf32> to vector<8x1xf32>
    %37 = tpu.reciprocal %36 {approx = true} : vector<8x1xf32> -> vector<8x1xf32>
    %38 = vector.broadcast %37 : vector<8x1xf32> to vector<8x8xf32>
    %39 = arith.mulf %34, %38 : vector<8x8xf32>
    %cst_23 = arith.constant dense<0.000000e+00> : vector<8x8xf32>
    %40 = tpu.matmul %39, %26, %cst_23 {dimension_numbers = #tpu.dot_dimension_numbers<[1], [0], [0], [1], [0, 0, 1, 1], [], []>} : vector<8x8xf32>, vector<8x8xf32>, vector<8x8xf32> -> vector<8x8xf32>
    %41 = vector.extract_strided_slice %20 {offsets = [0, 0], sizes = [8, 32], strides = [1, 1]} : vector<32x32xf32> to vector<8x32xf32>
    %cst_24 = arith.constant dense<0.000000e+00> : vector<8x32xf32>
    %42 = tpu.matmul %40, %41, %cst_24 {dimension_numbers = #tpu.dot_dimension_numbers<[1], [0], [0], [1], [0, 0, 1, 1], [], []>} : vector<8x8xf32>, vector<8x32xf32>, vector<8x32xf32> -> vector<8x32xf32>
    %43 = arith.addf %21, %42 : vector<8x32xf32>
    %44 = vector.extract_strided_slice %18 {offsets = [0, 8], sizes = [8, 8], strides = [1, 1]} : vector<8x96xf32> to vector<8x8xf32>
    %cst_25 = arith.constant 0.353553385 : f32
    %45 = vector.broadcast %cst_25 : f32 to vector<8x8xf32>
    %46 = arith.mulf %44, %45 : vector<8x8xf32>
    %47 = vector.extract_strided_slice %18 {offsets = [0, 40], sizes = [8, 8], strides = [1, 1]} : vector<8x96xf32> to vector<8x8xf32>
    %48 = vector.extract_strided_slice %18 {offsets = [0, 72], sizes = [8, 8], strides = [1, 1]} : vector<8x96xf32> to vector<8x8xf32>
    %cst_26 = arith.constant dense<0.000000e+00> : vector<8x8xf32>
    %49 = tpu.matmul %46, %47, %cst_26 {dimension_numbers = #tpu.dot_dimension_numbers<[1], [1], [0], [0], [0, 0, 1, 0], [], []>} : vector<8x8xf32>, vector<8x8xf32>, vector<8x8xf32> -> vector<8x8xf32>
    %50 = vector.broadcast %11 : vector<1x8xf32> to vector<8x8xf32>
    %51 = arith.addf %49, %50 : vector<8x8xf32>
    %cst_27 = arith.constant dense<0xFF800000> : vector<8xf32>
    %52 = vector.multi_reduction <maximumf>, %51, %cst_27 [1] : vector<8x8xf32> to vector<8xf32>
    %53 = vector.shape_cast %52 : vector<8xf32> to vector<8x1xf32>
    %54 = vector.broadcast %53 : vector<8x1xf32> to vector<8x8xf32>
    %55 = arith.subf %51, %54 : vector<8x8xf32>
    %56 = math.exp %55 : vector<8x8xf32>
    %cst_28 = arith.constant dense<0.000000e+00> : vector<8xf32>
    %57 = vector.multi_reduction <add>, %56, %cst_28 [1] : vector<8x8xf32> to vector<8xf32>
    %58 = vector.shape_cast %57 : vector<8xf32> to vector<8x1xf32>
    %59 = tpu.reciprocal %58 {approx = true} : vector<8x1xf32> -> vector<8x1xf32>
    %60 = vector.broadcast %59 : vector<8x1xf32> to vector<8x8xf32>
    %61 = arith.mulf %56, %60 : vector<8x8xf32>
    %cst_29 = arith.constant dense<0.000000e+00> : vector<8x8xf32>
    %62 = tpu.matmul %61, %48, %cst_29 {dimension_numbers = #tpu.dot_dimension_numbers<[1], [0], [0], [1], [0, 0, 1, 1], [], []>} : vector<8x8xf32>, vector<8x8xf32>, vector<8x8xf32> -> vector<8x8xf32>
    %63 = vector.extract_strided_slice %20 {offsets = [8, 0], sizes = [8, 32], strides = [1, 1]} : vector<32x32xf32> to vector<8x32xf32>
    %cst_30 = arith.constant dense<0.000000e+00> : vector<8x32xf32>
    %64 = tpu.matmul %62, %63, %cst_30 {dimension_numbers = #tpu.dot_dimension_numbers<[1], [0], [0], [1], [0, 0, 1, 1], [], []>} : vector<8x8xf32>, vector<8x32xf32>, vector<8x32xf32> -> vector<8x32xf32>
    %65 = arith.addf %43, %64 : vector<8x32xf32>
    %66 = vector.extract_strided_slice %18 {offsets = [0, 16], sizes = [8, 8], strides = [1, 1]} : vector<8x96xf32> to vector<8x8xf32>
    %cst_31 = arith.constant 0.353553385 : f32
    %67 = vector.broadcast %cst_31 : f32 to vector<8x8xf32>
    %68 = arith.mulf %66, %67 : vector<8x8xf32>
    %69 = vector.extract_strided_slice %18 {offsets = [0, 48], sizes = [8, 8], strides = [1, 1]} : vector<8x96xf32> to vector<8x8xf32>
    %70 = vector.extract_strided_slice %18 {offsets = [0, 80], sizes = [8, 8], strides = [1, 1]} : vector<8x96xf32> to vector<8x8xf32>
    %cst_32 = arith.constant dense<0.000000e+00> : vector<8x8xf32>
    %71 = tpu.matmul %68, %69, %cst_32 {dimension_numbers = #tpu.dot_dimension_numbers<[1], [1], [0], [0], [0, 0, 1, 0], [], []>} : vector<8x8xf32>, vector<8x8xf32>, vector<8x8xf32> -> vector<8x8xf32>
    %72 = vector.broadcast %11 : vector<1x8xf32> to vector<8x8xf32>
    %73 = arith.addf %71, %72 : vector<8x8xf32>
    %cst_33 = arith.constant dense<0xFF800000> : vector<8xf32>
    %74 = vector.multi_reduction <maximumf>, %73, %cst_33 [1] : vector<8x8xf32> to vector<8xf32>
    %75 = vector.shape_cast %74 : vector<8xf32> to vector<8x1xf32>
    %76 = vector.broadcast %75 : vector<8x1xf32> to vector<8x8xf32>
    %77 = arith.subf %73, %76 : vector<8x8xf32>
    %78 = math.exp %77 : vector<8x8xf32>
    %cst_34 = arith.constant dense<0.000000e+00> : vector<8xf32>
    %79 = vector.multi_reduction <add>, %78, %cst_34 [1] : vector<8x8xf32> to vector<8xf32>
    %80 = vector.shape_cast %79 : vector<8xf32> to vector<8x1xf32>
    %81 = tpu.reciprocal %80 {approx = true} : vector<8x1xf32> -> vector<8x1xf32>
    %82 = vector.broadcast %81 : vector<8x1xf32> to vector<8x8xf32>
    %83 = arith.mulf %78, %82 : vector<8x8xf32>
    %cst_35 = arith.constant dense<0.000000e+00> : vector<8x8xf32>
    %84 = tpu.matmul %83, %70, %cst_35 {dimension_numbers = #tpu.dot_dimension_numbers<[1], [0], [0], [1], [0, 0, 1, 1], [], []>} : vector<8x8xf32>, vector<8x8xf32>, vector<8x8xf32> -> vector<8x8xf32>
    %85 = vector.extract_strided_slice %20 {offsets = [16, 0], sizes = [8, 32], strides = [1, 1]} : vector<32x32xf32> to vector<8x32xf32>
    %cst_36 = arith.constant dense<0.000000e+00> : vector<8x32xf32>
    %86 = tpu.matmul %84, %85, %cst_36 {dimension_numbers = #tpu.dot_dimension_numbers<[1], [0], [0], [1], [0, 0, 1, 1], [], []>} : vector<8x8xf32>, vector<8x32xf32>, vector<8x32xf32> -> vector<8x32xf32>
    %87 = arith.addf %65, %86 : vector<8x32xf32>
    %88 = vector.extract_strided_slice %18 {offsets = [0, 24], sizes = [8, 8], strides = [1, 1]} : vector<8x96xf32> to vector<8x8xf32>
    %cst_37 = arith.constant 0.353553385 : f32
    %89 = vector.broadcast %cst_37 : f32 to vector<8x8xf32>
    %90 = arith.mulf %88, %89 : vector<8x8xf32>
    %91 = vector.extract_strided_slice %18 {offsets = [0, 56], sizes = [8, 8], strides = [1, 1]} : vector<8x96xf32> to vector<8x8xf32>
    %92 = vector.extract_strided_slice %18 {offsets = [0, 88], sizes = [8, 8], strides = [1, 1]} : vector<8x96xf32> to vector<8x8xf32>
    %cst_38 = arith.constant dense<0.000000e+00> : vector<8x8xf32>
    %93 = tpu.matmul %90, %91, %cst_38 {dimension_numbers = #tpu.dot_dimension_numbers<[1], [1], [0], [0], [0, 0, 1, 0], [], []>} : vector<8x8xf32>, vector<8x8xf32>, vector<8x8xf32> -> vector<8x8xf32>
    %94 = vector.broadcast %11 : vector<1x8xf32> to vector<8x8xf32>
    %95 = arith.addf %93, %94 : vector<8x8xf32>
    %cst_39 = arith.constant dense<0xFF800000> : vector<8xf32>
    %96 = vector.multi_reduction <maximumf>, %95, %cst_39 [1] : vector<8x8xf32> to vector<8xf32>
    %97 = vector.shape_cast %96 : vector<8xf32> to vector<8x1xf32>
    %98 = vector.broadcast %97 : vector<8x1xf32> to vector<8x8xf32>
    %99 = arith.subf %95, %98 : vector<8x8xf32>
    %100 = math.exp %99 : vector<8x8xf32>
    %cst_40 = arith.constant dense<0.000000e+00> : vector<8xf32>
    %101 = vector.multi_reduction <add>, %100, %cst_40 [1] : vector<8x8xf32> to vector<8xf32>
    %102 = vector.shape_cast %101 : vector<8xf32> to vector<8x1xf32>
    %103 = tpu.reciprocal %102 {approx = true} : vector<8x1xf32> -> vector<8x1xf32>
    %104 = vector.broadcast %103 : vector<8x1xf32> to vector<8x8xf32>
    %105 = arith.mulf %100, %104 : vector<8x8xf32>
    %cst_41 = arith.constant dense<0.000000e+00> : vector<8x8xf32>
    %106 = tpu.matmul %105, %92, %cst_41 {dimension_numbers = #tpu.dot_dimension_numbers<[1], [0], [0], [1], [0, 0, 1, 1], [], []>} : vector<8x8xf32>, vector<8x8xf32>, vector<8x8xf32> -> vector<8x8xf32>
    %107 = vector.extract_strided_slice %20 {offsets = [24, 0], sizes = [8, 32], strides = [1, 1]} : vector<32x32xf32> to vector<8x32xf32>
    %cst_42 = arith.constant dense<0.000000e+00> : vector<8x32xf32>
    %108 = tpu.matmul %106, %107, %cst_42 {dimension_numbers = #tpu.dot_dimension_numbers<[1], [0], [0], [1], [0, 0, 1, 1], [], []>} : vector<8x8xf32>, vector<8x32xf32>, vector<8x32xf32> -> vector<8x32xf32>
    %109 = arith.addf %87, %108 : vector<8x32xf32>
    %c0_43 = arith.constant 0 : index
    %c0_44 = arith.constant 0 : index
    %c0_45 = arith.constant 0 : index
    %110 = vector.load %arg7[%c0_43, %c0_44, %c0_45] : memref<1x1x32xf32, #tpu.memory_space<vmem>>, vector<1x1x32xf32>
    %111 = vector.shape_cast %110 : vector<1x1x32xf32> to vector<1x32xf32>
    %112 = vector.broadcast %111 : vector<1x32xf32> to vector<8x32xf32>
    %113 = arith.addf %109, %112 : vector<8x32xf32>
    %114 = arith.addf %113, %4 : vector<8x32xf32>
    %c0_46 = arith.constant 0 : index
    %c0_47 = arith.constant 0 : index
    %c0_48 = arith.constant 0 : index
    %115 = vector.load %arg8[%c0_46, %c0_47, %c0_48] : memref<1x1x32xf32, #tpu.memory_space<vmem>>, vector<1x1x32xf32>
    %116 = vector.shape_cast %115 : vector<1x1x32xf32> to vector<1x32xf32>
    %c0_49 = arith.constant 0 : index
    %c0_50 = arith.constant 0 : index
    %c0_51 = arith.constant 0 : index
    %117 = vector.load %arg9[%c0_49, %c0_50, %c0_51] : memref<1x1x32xf32, #tpu.memory_space<vmem>>, vector<1x1x32xf32>
    %118 = vector.shape_cast %117 : vector<1x1x32xf32> to vector<1x32xf32>
    %cst_52 = arith.constant dense<0.000000e+00> : vector<8xf32>
    %119 = vector.multi_reduction <add>, %114, %cst_52 [1] : vector<8x32xf32> to vector<8xf32>
    %120 = vector.shape_cast %119 : vector<8xf32> to vector<8x1xf32>
    %cst_53 = arith.constant 3.200000e+01 : f32
    %121 = vector.broadcast %cst_53 : f32 to vector<8x1xf32>
    %122 = arith.divf %120, %121 : vector<8x1xf32>
    %123 = arith.mulf %114, %114 : vector<8x32xf32>
    %cst_54 = arith.constant dense<0.000000e+00> : vector<8xf32>
    %124 = vector.multi_reduction <add>, %123, %cst_54 [1] : vector<8x32xf32> to vector<8xf32>
    %125 = vector.shape_cast %124 : vector<8xf32> to vector<8x1xf32>
    %cst_55 = arith.constant 3.200000e+01 : f32
    %126 = vector.broadcast %cst_55 : f32 to vector<8x1xf32>
    %127 = arith.divf %125, %126 : vector<8x1xf32>
    %128 = arith.mulf %122, %122 : vector<8x1xf32>
    %129 = arith.subf %127, %128 : vector<8x1xf32>
    %cst_56 = arith.constant 0.000000e+00 : f32
    %130 = vector.broadcast %cst_56 : f32 to vector<8x1xf32>
    %131 = arith.maximumf %129, %130 : vector<8x1xf32>
    %132 = vector.broadcast %122 : vector<8x1xf32> to vector<8x32xf32>
    %133 = arith.subf %114, %132 : vector<8x32xf32>
    %cst_57 = arith.constant 9.99999996E-13 : f32
    %134 = vector.broadcast %cst_57 : f32 to vector<8x1xf32>
    %135 = arith.addf %131, %134 : vector<8x1xf32>
    %136 = math.rsqrt %135 : vector<8x1xf32>
    %137 = vector.broadcast %136 : vector<8x1xf32> to vector<8x32xf32>
    %138 = arith.mulf %133, %137 : vector<8x32xf32>
    %139 = vector.broadcast %116 : vector<1x32xf32> to vector<8x32xf32>
    %140 = arith.mulf %138, %139 : vector<8x32xf32>
    %141 = vector.broadcast %118 : vector<1x32xf32> to vector<8x32xf32>
    %142 = arith.addf %140, %141 : vector<8x32xf32>
    %c0_58 = arith.constant 0 : index
    %c0_59 = arith.constant 0 : index
    %c0_60 = arith.constant 0 : index
    %143 = vector.load %arg10[%c0_58, %c0_59, %c0_60] : memref<1x32x64xf32, #tpu.memory_space<vmem>>, vector<1x32x64xf32>
    %144 = vector.shape_cast %143 : vector<1x32x64xf32> to vector<32x64xf32>
    %cst_61 = arith.constant dense<0.000000e+00> : vector<8x64xf32>
    %145 = tpu.matmul %142, %144, %cst_61 {dimension_numbers = #tpu.dot_dimension_numbers<[1], [0], [0], [1], [0, 0, 1, 1], [], []>} : vector<8x32xf32>, vector<32x64xf32>, vector<8x64xf32> -> vector<8x64xf32>
    %c0_62 = arith.constant 0 : index
    %c0_63 = arith.constant 0 : index
    %c0_64 = arith.constant 0 : index
    %146 = vector.load %arg11[%c0_62, %c0_63, %c0_64] : memref<1x1x64xf32, #tpu.memory_space<vmem>>, vector<1x1x64xf32>
    %147 = vector.shape_cast %146 : vector<1x1x64xf32> to vector<1x64xf32>
    %148 = vector.broadcast %147 : vector<1x64xf32> to vector<8x64xf32>
    %149 = arith.addf %145, %148 : vector<8x64xf32>
    %cst_65 = arith.constant 0.000000e+00 : f32
    %150 = vector.broadcast %cst_65 : f32 to vector<8x64xf32>
    %151 = arith.maximumf %149, %150 : vector<8x64xf32>
    %c0_66 = arith.constant 0 : index
    %c0_67 = arith.constant 0 : index
    %c0_68 = arith.constant 0 : index
    %152 = vector.load %arg12[%c0_66, %c0_67, %c0_68] : memref<1x64x32xf32, #tpu.memory_space<vmem>>, vector<1x64x32xf32>
    %153 = vector.shape_cast %152 : vector<1x64x32xf32> to vector<64x32xf32>
    %cst_69 = arith.constant dense<0.000000e+00> : vector<8x32xf32>
    %154 = tpu.matmul %151, %153, %cst_69 {dimension_numbers = #tpu.dot_dimension_numbers<[1], [0], [0], [1], [0, 0, 1, 1], [], []>} : vector<8x64xf32>, vector<64x32xf32>, vector<8x32xf32> -> vector<8x32xf32>
    %c0_70 = arith.constant 0 : index
    %c0_71 = arith.constant 0 : index
    %c0_72 = arith.constant 0 : index
    %155 = vector.load %arg13[%c0_70, %c0_71, %c0_72] : memref<1x1x32xf32, #tpu.memory_space<vmem>>, vector<1x1x32xf32>
    %156 = vector.shape_cast %155 : vector<1x1x32xf32> to vector<1x32xf32>
    %157 = vector.broadcast %156 : vector<1x32xf32> to vector<8x32xf32>
    %158 = arith.addf %154, %157 : vector<8x32xf32>
    %159 = arith.addf %158, %142 : vector<8x32xf32>
    %c0_73 = arith.constant 0 : index
    %c0_74 = arith.constant 0 : index
    %c0_75 = arith.constant 0 : index
    %160 = vector.load %arg14[%c0_73, %c0_74, %c0_75] : memref<1x1x32xf32, #tpu.memory_space<vmem>>, vector<1x1x32xf32>
    %161 = vector.shape_cast %160 : vector<1x1x32xf32> to vector<1x32xf32>
    %c0_76 = arith.constant 0 : index
    %c0_77 = arith.constant 0 : index
    %c0_78 = arith.constant 0 : index
    %162 = vector.load %arg15[%c0_76, %c0_77, %c0_78] : memref<1x1x32xf32, #tpu.memory_space<vmem>>, vector<1x1x32xf32>
    %163 = vector.shape_cast %162 : vector<1x1x32xf32> to vector<1x32xf32>
    %cst_79 = arith.constant dense<0.000000e+00> : vector<8xf32>
    %164 = vector.multi_reduction <add>, %159, %cst_79 [1] : vector<8x32xf32> to vector<8xf32>
    %165 = vector.shape_cast %164 : vector<8xf32> to vector<8x1xf32>
    %cst_80 = arith.constant 3.200000e+01 : f32
    %166 = vector.broadcast %cst_80 : f32 to vector<8x1xf32>
    %167 = arith.divf %165, %166 : vector<8x1xf32>
    %168 = arith.mulf %159, %159 : vector<8x32xf32>
    %cst_81 = arith.constant dense<0.000000e+00> : vector<8xf32>
    %169 = vector.multi_reduction <add>, %168, %cst_81 [1] : vector<8x32xf32> to vector<8xf32>
    %170 = vector.shape_cast %169 : vector<8xf32> to vector<8x1xf32>
    %cst_82 = arith.constant 3.200000e+01 : f32
    %171 = vector.broadcast %cst_82 : f32 to vector<8x1xf32>
    %172 = arith.divf %170, %171 : vector<8x1xf32>
    %173 = arith.mulf %167, %167 : vector<8x1xf32>
    %174 = arith.subf %172, %173 : vector<8x1xf32>
    %cst_83 = arith.constant 0.000000e+00 : f32
    %175 = vector.broadcast %cst_83 : f32 to vector<8x1xf32>
    %176 = arith.maximumf %174, %175 : vector<8x1xf32>
    %177 = vector.broadcast %167 : vector<8x1xf32> to vector<8x32xf32>
    %178 = arith.subf %159, %177 : vector<8x32xf32>
    %cst_84 = arith.constant 9.99999996E-13 : f32
    %179 = vector.broadcast %cst_84 : f32 to vector<8x1xf32>
    %180 = arith.addf %176, %179 : vector<8x1xf32>
    %181 = math.rsqrt %180 : vector<8x1xf32>
    %182 = vector.broadcast %181 : vector<8x1xf32> to vector<8x32xf32>
    %183 = arith.mulf %178, %182 : vector<8x32xf32>
    %184 = vector.broadcast %161 : vector<1x32xf32> to vector<8x32xf32>
    %185 = arith.mulf %183, %184 : vector<8x32xf32>
    %186 = vector.broadcast %163 : vector<1x32xf32> to vector<8x32xf32>
    %187 = arith.addf %185, %186 : vector<8x32xf32>
    %c0_85 = arith.constant 0 : index
    %c0_86 = arith.constant 0 : index
    %c0_87 = arith.constant 0 : index
    %188 = vector.load %arg16[%c0_85, %c0_86, %c0_87] : memref<1x8x32xf32, #tpu.memory_space<vmem>>, vector<1x8x32xf32>
    %189 = vector.shape_cast %188 : vector<1x8x32xf32> to vector<8x32xf32>
    %190 = vector.shape_cast %187 : vector<8x32xf32> to vector<1x8x32xf32>
    tpu.vector_store %arg16[%c0_85, %c0_86, %c0_87], %190 {strides = array<i32>} : memref<1x8x32xf32, #tpu.memory_space<vmem>>, vector<1x8x32xf32>,
    return
  }
  func.func @transform_0(%arg0: i32, %arg1: i32) -> (i32, i32, i32) {
    %c0_i32 = arith.constant 0 : i32
    %c0_i32_0 = arith.constant 0 : i32
    %c0_i32_1 = arith.constant 0 : i32
    return %arg0, %c0_i32, %c0_i32_0 : i32, i32, i32
  }
  func.func @transform_1(%arg0: i32, %arg1: i32) -> (i32, i32, i32) {
    %c0_i32 = arith.constant 0 : i32
    %c0_i32_0 = arith.constant 0 : i32
    %c0_i32_1 = arith.constant 0 : i32
    return %arg0, %c0_i32, %c0_i32_0 : i32, i32, i32
  }
  func.func @transform_2(%arg0: i32, %arg1: i32) -> (i32, i32, i32) {
    %c0_i32 = arith.constant 0 : i32
    %c0_i32_0 = arith.constant 0 : i32
    %c0_i32_1 = arith.constant 0 : i32
    return %arg1, %c0_i32, %c0_i32_0 : i32, i32, i32
  }
  func.func @transform_3(%arg0: i32, %arg1: i32) -> (i32, i32, i32) {
    %c0_i32 = arith.constant 0 : i32
    %c0_i32_0 = arith.constant 0 : i32
    %c0_i32_1 = arith.constant 0 : i32
    return %arg1, %c0_i32, %c0_i32_0 : i32, i32, i32
  }
  func.func @transform_4(%arg0: i32, %arg1: i32) -> (i32, i32, i32) {
    %c0_i32 = arith.constant 0 : i32
    %c0_i32_0 = arith.constant 0 : i32
    %c0_i32_1 = arith.constant 0 : i32
    return %arg1, %c0_i32, %c0_i32_0 : i32, i32, i32
  }
  func.func @transform_5(%arg0: i32, %arg1: i32) -> (i32, i32, i32) {
    %c0_i32 = arith.constant 0 : i32
    %c0_i32_0 = arith.constant 0 : i32
    %c0_i32_1 = arith.constant 0 : i32
    return %arg1, %c0_i32, %c0_i32_0 : i32, i32, i32
  }
  func.func @transform_6(%arg0: i32, %arg1: i32) -> (i32, i32, i32) {
    %c0_i32 = arith.constant 0 : i32
    %c0_i32_0 = arith.constant 0 : i32
    %c0_i32_1 = arith.constant 0 : i32
    return %arg1, %c0_i32, %c0_i32_0 : i32, i32, i32
  }
  func.func @transform_7(%arg0: i32, %arg1: i32) -> (i32, i32, i32) {
    %c0_i32 = arith.constant 0 : i32
    %c0_i32_0 = arith.constant 0 : i32
    %c0_i32_1 = arith.constant 0 : i32
    return %arg1, %c0_i32, %c0_i32_0 : i32, i32, i32
  }
  func.func @transform_8(%arg0: i32, %arg1: i32) -> (i32, i32, i32) {
    %c0_i32 = arith.constant 0 : i32
    %c0_i32_0 = arith.constant 0 : i32
    %c0_i32_1 = arith.constant 0 : i32
    return %arg1, %c0_i32, %c0_i32_0 : i32, i32, i32
  }
  func.func @transform_9(%arg0: i32, %arg1: i32) -> (i32, i32, i32) {
    %c0_i32 = arith.constant 0 : i32
    %c0_i32_0 = arith.constant 0 : i32
    %c0_i32_1 = arith.constant 0 : i32
    return %arg1, %c0_i32, %c0_i32_0 : i32, i32, i32
  }
  func.func @transform_10(%arg0: i32, %arg1: i32) -> (i32, i32, i32) {
    %c0_i32 = arith.constant 0 : i32
    %c0_i32_0 = arith.constant 0 : i32
    %c0_i32_1 = arith.constant 0 : i32
    return %arg1, %c0_i32, %c0_i32_0 : i32, i32, i32
  }
  func.func @transform_11(%arg0: i32, %arg1: i32) -> (i32, i32, i32) {
    %c0_i32 = arith.constant 0 : i32
    %c0_i32_0 = arith.constant 0 : i32
    %c0_i32_1 = arith.constant 0 : i32
    return %arg1, %c0_i32, %c0_i32_0 : i32, i32, i32
  }
  func.func @transform_12(%arg0: i32, %arg1: i32) -> (i32, i32, i32) {
    %c0_i32 = arith.constant 0 : i32
    %c0_i32_0 = arith.constant 0 : i32
    %c0_i32_1 = arith.constant 0 : i32
    return %arg1, %c0_i32, %c0_i32_0 : i32, i32, i32
  }
  func.func @transform_13(%arg0: i32, %arg1: i32) -> (i32, i32, i32) {
    %c0_i32 = arith.constant 0 : i32
    %c0_i32_0 = arith.constant 0 : i32
    %c0_i32_1 = arith.constant 0 : i32
    return %arg1, %c0_i32, %c0_i32_0 : i32, i32, i32
  }
  func.func @transform_14(%arg0: i32, %arg1: i32) -> (i32, i32, i32) {
    %c0_i32 = arith.constant 0 : i32
    %c0_i32_0 = arith.constant 0 : i32
    %c0_i32_1 = arith.constant 0 : i32
    return %arg0, %c0_i32, %c0_i32_0 : i32, i32, i32
  }
}

</mosaic_0001>

<bundles_post_ra>
// kernel: tpu_custom_call.1
= control target key start
LH: loop header
LB: loop body
LE: loop exit
PB: predicated region body
PF: predicated region fallthrough
CT: control target
= control target key end

     0   :  { %s2604_s0 = inlined_call_operand.hbm [shape: f32[2,1,8], index: 0, kind: input, shape index: {}]   ;;  %s2605_s1 = inlined_call_operand.hbm [shape: f32[2,8,32], index: 1, kind: input, shape index: {}]   ;;  %s2606_s2 = inlined_call_operand.vmem [shape: f32[2,32,96], index: 2, kind: input, shape index: {}]   ;;  %s2607_s3 = inlined_call_operand.vmem [shape: f32[2,1,96], index: 3, kind: input, shape index: {}]   ;;  %s2608_s4 = inlined_call_operand.vmem [shape: f32[2,32,32], index: 4, kind: input, shape index: {}]   ;;  %s2609_s5 = inlined_call_operand.hbm [shape: f32[2,1,32], index: 5, kind: input, shape index: {}]   ;;  %s2610_s6 = inlined_call_operand.vmem [shape: f32[2,1,32], index: 6, kind: input, shape index: {}]   ;;  %s2611_s7 = inlined_call_operand.hbm [shape: f32[2,1,32], index: 7, kind: input, shape index: {}]   ;;  %s2612_s8 = inlined_call_operand.vmem [shape: f32[2,32,64], index: 8, kind: input, shape index: {}]   ;;  %s2613_s9 = inlined_call_operand.vmem [shape: f32[2,1,64], index: 9, kind: input, shape index: {}]   ;;  %s2614_s10 = inlined_call_operand.vmem [shape: f32[2,64,32], index: 10, kind: input, shape index: {}]   ;;  %s2615_s11 = inlined_call_operand.vmem [shape: f32[2,1,32], index: 11, kind: input, shape index: {}]   ;;  %s2616_s12 = inlined_call_operand.vmem [shape: f32[2,1,32], index: 12, kind: input, shape index: {}]   ;;  %s2617_s13 = inlined_call_operand.hbm [shape: f32[2,1,32], index: 13, kind: input, shape index: {}]   ;;  %s2618_s14 = inlined_call_operand.hbm [shape: f32[2,8,32], index: 14, kind: output, shape index: {}]  }
   0x1   :  { %2637 = sst [smem:[#allocation33_spill]] %s2604_s0 }
   0x2   :  { %2638 = sst [smem:[#allocation34_spill]] %s2605_s1 }
   0x3   :  { %2639 = sst [smem:[#allocation35_spill]] %s2606_s2 }
   0x4   :  { %2640 = sst [smem:[#allocation36_spill]] %s2607_s3 }
   0x5   :  { %2641 = sst [smem:[#allocation37_spill]] %s2608_s4 }
   0x6   :  { %2642 = sst [smem:[#allocation38_spill]] %s2609_s5 }
   0x7   :  { %2643 = sst [smem:[#allocation39_spill]] %s2610_s6 }
   0x8   :  { %2644 = sst [smem:[#allocation40_spill]] %s2611_s7 }
   0x9   :  { %2645 = sst [smem:[#allocation41_spill]] %s2612_s8 }
   0xa   :  { %2646 = sst [smem:[#allocation42_spill]] %s2613_s9 }
   0xb   :  { %2647 = sst [smem:[#allocation43_spill]] %s2614_s10 }
   0xc   :  { %2648 = sst [smem:[#allocation44_spill]] %s2615_s11 }
   0xd   :  { %2649 = sst [smem:[#allocation45_spill]] %s2616_s12 }
   0xe   :  { %2650 = sst [smem:[#allocation46_spill]] %s2617_s13 }
   0xf   :  { %2651 = sst [smem:[#allocation47_spill]] %s2618_s14 }
  0x10   :  { %19 = vsyncpa [#allocation3], 0 }
  0x11   :  { %21 = vsyncpa [#allocation3 + $0x1], 0 }
  0x12   :  { %22 = vsyncpa [#allocation6], 0 }
  0x13   :  { %24 = vsyncpa [#allocation6 + $0x1], 0 }
  0x14   :  { %25 = vsyncpa [#allocation9], 0 }
  0x15   :  { %27 = vsyncpa [#allocation9 + $0x1], 0 }
  0x16   :  { %28 = vsyncpa [#allocation4], 0 }
  0x17   :  { %30 = vsyncpa [#allocation4 + $0x1], 0  ;;  %s2184_s29 = smov 0   ;;  %s2186_s30 = smov 0  }
  0x18   :  { %s2188_s15 = smov 0   ;;  %s2190_s16 = smov 0  }
  0x19   :  { %s2192_s17 = smov 0   ;;  %s2194_s18 = smov 0  }
  0x1a   :  { %s2196_s19 = smov 0   ;;  %s2198_s20 = smov 0  }
  0x1b   :  { %s2200_s21 = smov 0   ;;  %s2202_s22 = smov 0  }
  0x1c   :  { %s2204_s23 = smov 0  }
  0x1d LB: > { %2652 = sst [smem:[#allocation17_spill]] %s2058_s30  ;;  %s2240_s24 = sadd.s32 4294967295, %s2094_s23   ;;  %s2094_s23 = sphi %s2204_s23, %s36_s23   ;;  %s2090_s22 = sphi %s2202_s22, %s2720_s22   ;;  %s2086_s21 = sphi %s2200_s21, %s2719_s21   ;;  %s2082_s20 = sphi %s2198_s20, %s2718_s20   ;;  %s2078_s19 = sphi %s2196_s19, %s2717_s19   ;;  %s2074_s18 = sphi %s2194_s18, %s2716_s18   ;;  %s2070_s17 = sphi %s2192_s17, %s2715_s17   ;;  %s2066_s16 = sphi %s2190_s16, %s2714_s16   ;;  %s2062_s15 = sphi %s2188_s15, %s2713_s15   ;;  %s2058_s30 = sphi %s2186_s30, %s2712_s30   ;;  %s2054_s29 = sphi %s2184_s29, %s2711_s29  }
  0x1e   : > { %2653 = sst [smem:[#allocation18_spill]] %s2062_s15  ;;  %s1601_s25 = sadd.s32 4294967294, %s2094_s23  }
  0x1f   : > { %2654 = sst [smem:[#allocation19_spill]] %s2066_s16  ;;  %p62_p0 = scmp.ne.s32.totalorder %s2074_s18, %s2070_s17 }
  0x20   : > { %2655 = sst [smem:[#allocation20_spill]] %s2070_s17  ;;  %p63_p1 = scmp.eq.s32.totalorder %s2094_s23, 0 }
  0x21   : > { %2656 = sst [smem:[#allocation21_spill]] %s2074_s18  ;;  %p68_p2 = scmp.ne.s32.totalorder %s2070_s17, %s2066_s16 }
  0x22   : > { %2657 = sst [smem:[#allocation22_spill]] %s2078_s19  ;;  %p69_p3 = scmp.eq.s32.totalorder %s2240_s24, 0 }
  0x23   : > { %2658 = sst [smem:[#allocation23_spill]] %s2082_s20  ;;  %p64_p4 = por %p63_p1, %p62_p0 }
  0x24   : > { %2659 = sst [smem:[#allocation24_spill]] %s2086_s21  ;;  %p430_p5 = scmp.eq.s32.totalorder %s2240_s24, 3 }
  0x25   : > { %2660 = sst [smem:[#allocation25_spill]] %s2090_s22  ;;  %p2256_p6 = por %p69_p3, %p68_p2 }
  0x26   : > { %p436_p7 = scmp.eq.s32.totalorder %s1601_s25, 3  ;;  %p2260_p8 = por %p430_p5, %p62_p0 }
  0x27   : > { %p2624_p10 = scmp.lt.s32.totalorder %s2094_s23, 4  ;;  %s2270_s26 = sand.u32 1, %s2074_s18  }
  0x28   : > { %s2662_s14 = scalar_select %p2260_p8, 1, 0 }
  0x29   : > { %p2264_p9 = por %p436_p7, %p68_p2  ;;  %p2275_p11 = pnand %p2624_p10, %p64_p4 }
  0x2a   : > { %2663 = sst [smem:[#allocation26_spill]] %s2662_s14  ;;  %s1604_s20 = sshll.u32 %s2270_s26, 3 }
  0x2b   : > { %s2664_s27 = scalar_select %p2264_p9, 1, 0 }
  0x2c   : > { %s1605_s14 = sshll.u32 %s2090_s22, 3  ;;  %s2667_s1 = sld [smem:[#allocation34_spill]] }
  0x2d   : > { %2665 = sst [smem:[#allocation27_spill]] %s2664_s27  ;;  %s477_s10 = scalar_lea.vmem [#allocation5], %s1604_s20 }
  0x2e   : > { %s485_s16 = sshll.u32 %s477_s10, 4  ;;  %p1606_p12 = scmp.ge.s32.totalorder %s2094_s23, 1  ;;  %s486_s16 = int_to_ptr.vmem [resolvable:$true] %s485_s16 }
  0x2f   : > { %s2668_s8 = sand.u32 1, %s2094_s23   ;;  %p603_p13 = scmp.lt.s32.totalorder %s2094_s23, 5 }
  0x30   : > { %s2287_s6 = scalar_lea.sflag [#allocation6], %s2668_s8  ;;  %s45_s10 = sadd.s32 1, %s2086_s21 }
  0x31   : > { %p2293_p0 = pnand %p1606_p12, %p603_p13  ;;  %p46_p2 = scmp.ge.s32.totalorder %s45_s10, 2 }
  0x32   : > { %s481_s11 = scalar_lea.hbm %s2667_s1, %s1605_s14  ;;  %p192_p4 = scmp.ne.s32.totalorder %s2062_s15, %s2058_s30 }
  0x33   : > { %s483_s9 = sshll.u32 %s481_s11, 4  ;;  %s185_s11 = sadd.s32 1, %s2062_s15  ;;  %s484_s9 = int_to_ptr.hbm [resolvable:$true] %s483_s9 }
  0x34   : > { %1663 = dma.hbm_to_vmem [thread:$0]  (!%p2275_p11), %s484_s9, 128, %s486_s16, %s2287_s6  }
  0x35   : > { %p198_p5 = scmp.ne.s32.totalorder %s2058_s30, %s2054_s29  ;;  %s2304_s8 = sand.u32 1, %s2062_s15  }
  0x36   : > { %s2722_s10 = smov (%p46_p2, %s45_s10), 0  ;;  %s2671_s9 = sadd.s32 1, %s2090_s22 }
  0x37   : > { %2670 = sst [smem:[#allocation28_spill]] %s2722_s10  ;;  %s2724_s9 = smov (!%p46_p2, %s2671_s9), %s2090_s22 }
  0x38   : > { %s182_s14 = ssub.s32 %s2086_s21, %s2722_s10  ;;  %p194_p7 = por %p192_p4, %p63_p1 }
  0x39   : > { %p50_p12 = scmp.ge.s32.totalorder %s2724_s9, 2  ;;  %p183_p13 = scmp.eq.s32.totalorder %s182_s14, 0 }
  0x3a   : > { %p2317_p10 = por %p198_p5, %p69_p3  ;;  %p2674_p9 = scmp.lt.s32.totalorder %s2094_s23, 4 }
  0x3b   : > { %s2726_s9 = smov (%p50_p12, %s2724_s9), 0  ;;  %s2678_s7 = sld [smem:[#allocation40_spill]] }
  0x3c   : > { %s2672_s16 = scalar_select %p2317_p10, 1, 0 }
  0x3d   : > { %p2323_p8 = pnand %p2674_p9, %p194_p7  ;;  %2676 = sst [smem:[#allocation30_spill]] %s2726_s9 }
  0x3e   : > { %2673 = sst [smem:[#allocation29_spill]] %s2672_s16  ;;  %s52_s27 = ssub.s32 %s2090_s22, %s2726_s9 }
  0x3f   : > { %s2330_s20 = scalar_select %p183_p13, %s2062_s15, %s185_s11  }
  0x40   : > { %p53_p1 = scmp.eq.s32.totalorder %s52_s27, 0  ;;  %s2679_s4 = sadd.s32 1, %s2074_s18 }
  0x41   : > { %2677 = sst [smem:[#allocation31_spill]] %s2330_s20  ;;  %s543_s10 = scalar_lea.hbm %s2678_s7, %s2086_s21 }
  0x42   : > { %s2341_s2 = scalar_select %p53_p1, %s2074_s18, %s2679_s4  }
  0x43   : > { %s545_s3 = sshll.u32 %s543_s10, 4  ;;  %s540_s19 = scalar_lea.vmem [#allocation8], %s2304_s8  ;;  %s546_s3 = int_to_ptr.hbm [resolvable:$true] %s545_s3 }
  0x44   : > { %2680 = sst [smem:[#allocation32_spill]] %s2341_s2  ;;  %s547_s16 = sshll.u32 %s540_s19, 4  ;;  %s548_s16 = int_to_ptr.vmem [resolvable:$true] %s547_s16 }
  0x45   : > { %s2681_s11 = sand.u32 1, %s2094_s23   ;;  %s2682_s0 = sld [smem:[#allocation33_spill]] }
  0x46   : > { %s538_s20 = scalar_lea.sflag [#allocation9], %s2681_s11  ;;  %s459_s4 = scalar_lea.vmem [#allocation2], %s2270_s26 }
  0x47   : > { %1669 = dma.hbm_to_vmem [thread:$0]  (!%p2323_p8), %s546_s3, 16, %s548_s16, %s538_s20  }
  0x48   : > { %s466_s7 = sshll.u32 %s459_s4, 4  ;;  %s457_s19 = scalar_lea.sflag [#allocation3], %s2270_s26  ;;  %s467_s7 = int_to_ptr.vmem [resolvable:$true] %s466_s7 }
  0x49   : > { %s2683_s5 = sld [smem:[#allocation38_spill]]  ;;  %s517_s3 = scalar_lea.vmem [#allocation7], %s2304_s8 }
  0x4a   : > { %s524_s16 = sshll.u32 %s517_s3, 4  ;;  %s2684_s13 = sld [smem:[#allocation46_spill]]  ;;  %s525_s16 = int_to_ptr.vmem [resolvable:$true] %s524_s16 }
  0x4b   : > { %s462_s14 = scalar_lea.hbm %s2682_s0, %s2090_s22  ;;  %s591_s4 = scalar_lea.vmem [#allocation10], %s2304_s8 }
  0x4c   : > { %s464_s10 = sshll.u32 %s462_s14, 4  ;;  %s598_s0 = sshll.u32 %s591_s4, 4  ;;  %s465_s10 = int_to_ptr.hbm [resolvable:$true] %s464_s10  ;;  %s599_s0 = int_to_ptr.vmem [resolvable:$true] %s598_s0 }
  0x4d   : > { %1660 = dma.hbm_to_vmem [thread:$0]  (!%p2275_p11), %s465_s10, 16, %s467_s7, %s457_s19  }
  0x4f   : > { %s520_s2 = scalar_lea.hbm %s2683_s5, %s2086_s21  ;;  %607 = sbr.rel (%p2293_p0) target bundleno = 2130 (0x852), region = 76 }
  0x50   : > { %s522_s18 = sshll.u32 %s520_s2, 4  ;;  %s594_s14 = scalar_lea.hbm %s2684_s13, %s2086_s21  ;;  %s523_s18 = int_to_ptr.hbm [resolvable:$true] %s522_s18 }
  0x51   : > { %1666 = dma.hbm_to_vmem [thread:$0]  (!%p2323_p8), %s523_s18, 16, %s525_s16, %s2287_s6  }
  0x52   : > { %s596_s26 = sshll.u32 %s594_s14, 4  ;;  %s2374_s2 = sand.u32 (!%p2293_p0), 1, %s2070_s17   ;;  %s597_s26 = int_to_ptr.hbm [resolvable:$true] %s596_s26 }
  0x53   : > { %1672 = dma.hbm_to_vmem [thread:$0]  (!%p2323_p8), %s597_s26, 16, %s599_s0, %s538_s20  }
  0x54   : > { %s610_s6 = scalar_lea.sflag [#allocation3], %s2374_s2 }
  0x55   : > { %2033 = dma.done.wait (%p2256_p6), %s610_s6, 16  }
  0x56   : > { %2035 = vsyncadd (%p2256_p6), %s610_s6, 4294967280  ;;  %s618_s0 = sand.u32 1, %s2240_s24   ;;  %s1607_s18 = sshll.u32 %s2374_s2, 3 }
  0x57   : > { %s619_s25 = scalar_lea.sflag [#allocation6], %s618_s0  ;;  %s622_s12 = scalar_lea.vmem [#allocation5], %s1607_s18 }
  0x58   : > { %2037 = dma.done.wait (%p2256_p6), %s619_s25, 128  }
  0x59   : > { %2039 = vsyncadd (%p2256_p6), %s619_s25, 4294967168  ;;  %s2389_s9 = sand.u32 1, %s2058_s30  }
  0x5a   : > { %2041 = dma.done.wait (%p2317_p10), %s619_s25, 16  }
  0x5b   : > { %2043 = vsyncadd (%p2317_p10), %s619_s25, 4294967280  ;;  %s638_s24 = scalar_lea.sflag [#allocation9], %s618_s0 }
  0x5c   : > { %2045 = dma.done.wait (%p2317_p10), %s638_s24, 32  }
  0x5d   : > { %2047 = vsyncadd (%p2317_p10), %s638_s24, 4294967264  ;;  %s2686_s28 = sld [smem:[#allocation22_spill]]  ;;  %s649_s13 = scalar_lea.vmem [#allocation10], %s2389_s9 }
  0x5e   : > { %s2687_s16 = sld [smem:[#allocation36_spill]] }
  0x5f   : > { %s2688_s4 = sld [smem:[#allocation35_spill]] }
  0x60   : > { %s2689_s25 = sld [smem:[#allocation37_spill]] }
  0x61   : > { %s2691_s22 = sld [smem:[#allocation41_spill]] }
  0x62   : > { %s2693_s15 = sld [smem:[#allocation43_spill]] }
  0x63   : > { %p746_p3 = scmp.lt.s32.totalorder %s2686_s28, 1  ;;  %s2694_s30 = sld [smem:[#allocation44_spill]] }
  0x64   : > { %s2695_s7 = sld [smem:[#allocation45_spill]]  ;;  %p1617_p6 = scmp.ne.s32.totalorder %s2686_s28, 0 }
  0x65   : > { %s2403_s10 = scalar_select %p746_p3, %s2686_s28, 1 }
  0x67   : > { %s1641_s19 = sshll.u32 %s2403_s10, 5  ;;  %s753_s1 = scalar_lea.vmem %s2687_s16, %s2403_s10 }
  0x68   : > { %s750_s26 = scalar_lea.vmem %s2688_s4, %s1641_s19  ;;  %s2416_s8 = scalar_lea.vmem %s2689_s25, %s1641_s19 }
  0x69   : > { %s2425_s21 = scalar_lea.vmem %s2691_s22, %s1641_s19  ;;  %s2692_s16 = sld [smem:[#allocation42_spill]] }
  0x6a   : > { %s1644_s27 = sshll.u32 %s2403_s10, 6  ;;  %s777_s20 = scalar_lea.vmem %s2694_s30, %s2403_s10 }
  0x6b   : > { %s2435_s6 = scalar_lea.vmem %s2693_s15, %s1644_s27  ;;  %s780_s5 = scalar_lea.vmem %s2695_s7, %s2403_s10 }
  0x6c   : > { %s2446_s22 = scalar_lea.vmem [#allocation11], %s1607_s18  ;;  %784 = sbr.rel (%p1617_p6) target bundleno = 115 (0x73), region = 100 }
  0x6f   : > { %s769_s17 = scalar_lea.vmem %s2692_s16, %s2403_s10 }
  0x71   : > { %v785_v0 = vld [vmem:[%s622_s12] sm:$0xff]  ;;  %vm786_vm0 = vcmask 261120  }
  0x72   : > { %787 = vst.msk [vmem:[%s2446_s22] sm:$0xff] %vm786_vm0, %v785_v0 }
  0x73 PF: > { %v795_v1 = vld [vmem:[%s750_s26 + $0x18] sm:$0xff]  ;;  %v794_v2 = vld [vmem:[%s750_s26 + $0x10] sm:$0xff]  ;;  %v793_v3 = vld [vmem:[%s750_s26 + $0x8] sm:$0xff]  ;;  %vm800_vm1 = vcmask 261120   ;;  %s2096_s30 = smov 88   ;;  %s2097_s15 = smov 96  }
  0x74   : > { %816 = vmatpush.msra.mxu0 %v795_v1  ;;  %v792_v4 = vld [vmem:[%s750_s26] sm:$0xff]  ;;  %s2098_s7 = smov 120   ;;  %s2099_s18 = smov 72   ;;  %vm835_vm2 = vcmask 64512   ;;  %v2102_v18 = vmov -1e+09  }
  0x75   : > { %v1780_v6 = vld [vmem:[%s753_s1] ss:$0 sm:$0xff]  ;;  %s2100_s12 = smov 104   ;;  %s2101_s28 = smov 80   ;;  %vm1279_vm8 = vcmask 523264  }
  0x76   : > { %817 = vmatpush.msra.mxu0 %v794_v2  ;;  %v824_v10 = vld [vmem:[%s2416_s8] sm:$0xff]  ;;  %s2696_s19 = scalar_lea.vmem [#allocation2], %s2374_s2  ;;  %s2103_s1 = smov 64  }
  0x77   : > { %1004 = vmatpush.msra.mxu3 %v824_v10  ;;  %v789_v17 = vld [vmem:[%s2696_s19] sm:$0x1]  ;;  %s2104_s26 = smov 112   ;;  %s2105_s11 = smov 48   ;;  %v825_v10 = vld [vmem:[%s2416_s8 + $0x8] sm:$0xff] }
  0x78   : > { %818 = vmatpush.msra.mxu0 %v793_v3  ;;  %vm790_vm3 = vcmp.ne.f32.partialorder %v789_v17, 0.0  ;;  %s2106_s3 = smov 56   ;;  %s2107_s16 = smov 40  }
  0x79   : > { %v2451_v5 = vld [vmem:[%s2446_s22] sm:$0xff]  ;;  %v791_v19 = vsel %vm790_vm3, 0.0, %v2102_v18  ;;  %s2697_s27 = scalar_lea.vmem [#allocation7], %s2389_s9  ;;  %s2698_s14 = sld [smem:[#allocation39_spill]] }
  0x7a   : > { %819 = vmatpush.msra.mxu0 %v792_v4  ;;  %v830_v20 = vperm.slane %v791_v19, 0  ;;  %v1781_v19 = vld [vmem:[%s2697_s27] ss:$0 sm:$0xff]  ;;  %s2700_s0 = scalar_lea.vmem [#allocation8], %s2389_s9  ;;  %s1341_s27 = scalar_lea.sflag [#allocation4], %s2374_s2 }
  0x7b   : > { %1618 = vmatmul.msk.f32.vlgmr.msra.gmra.mxu0 %vm800_vm1, %v2451_v5 }
  0x7f   : > { %s2699_s4 = scalar_lea.vmem %s2698_s14, %s2403_s10 }
  0xf8   : > { %v821_v7 = vpop.f32.mrf.mxu0 }
  0xf9   : > { %v2455_v8 = vadd.f32 %v1780_v6, %v821_v7 }
  0xfb   : > { %900 = vrot.lane.b32.xlu2 %v2455_v8, %s2096_s30  ;;  %833 = vrot.lane.b32.xlu0 %v2455_v8, %s2097_s15  ;;  %v828_v9 = vmul.f32 0.35355338, %v2455_v8 }
 0x103   : > { %898 = vrot.lane.b32.xlu2 %v828_v9, %s2098_s7 }
 0x10b   : > { %1100 = vrot.lane.b32.xlu2 %v2455_v8, %s2099_s18 }
 0x113   : > { %1098 = vrot.lane.b32.xlu2 %v828_v9, %s2100_s12 }
 0x11b   : > { %1011 = vrot.lane.b32.xlu2 %v2455_v8, %s2101_s28 }
 0x155   : > { %v901_v11 = vpop.permute.xlu2 %900 }
 0x156   : > { %1622 = vmatpush.xpose.msk.msrb.mxu0 %vm835_vm2, %v901_v11 }
 0x15d   : > { %v899_v12 = vpop.permute.xlu2 %898 }
 0x15e   : > { %1623 = vmatmul.msk.f32.vlgmr.msrb.gmra.mxu0 %vm835_vm2, %v899_v12 }
 0x165   : > { %v1101_v13 = vpop.permute.xlu2 %1100 }
 0x166   : > { %1631 = vmatpush.xpose.msk.msrb.mxu3 %vm835_vm2, %v1101_v13  ;;  %v827_v13 = vld [vmem:[%s2416_s8 + $0x18] sm:$0xff] }
 0x16d   : > { %v834_v14 = vpop.permute.xlu0 %833  ;;  %v1099_v15 = vpop.permute.xlu2 %1098 }
 0x16e   : > { %1619 = vmatpush.xpose.msk.msra.mxu1 %vm835_vm2, %v834_v14 }
 0x171   : > { %1620 = vmatmul.msk.f32.vlgmr.msra.gmra.mxu1 %vm835_vm2, %v828_v9 }
 0x172   : > { %981 = vmatpush.msrb.mxu1 %v825_v10 }
 0x175   : > { %v1012_v16 = vpop.permute.xlu2 %1011 }
 0x176   : > { %1627 = vmatpush.xpose.msk.msra.mxu0 %vm835_vm2, %v1012_v16 }
 0x1db   : > { %v923_v21 = vpop.f32.mrf.mxu0 }
 0x1dc   : > { %v924_v22 = vadd.f32 %v923_v21, %v830_v20 }
 0x1de   : > { %v926_v23 = vsel %vm835_vm2, %v924_v22, -inf }
 0x1df   : > { %927 = vmax.xlane.f32.xlu2 %v926_v23 }
 0x1ee   : > { %v858_v24 = vpop.f32.mrf.mxu1 }
 0x1ef   : > { %v859_v25 = vadd.f32 %v858_v24, %v830_v20 }
 0x1f1   : > { %v861_v26 = vsel %vm835_vm2, %v859_v25, -inf }
 0x1f2   : > { %862 = vmax.xlane.f32.xlu0 %v861_v26 }
 0x252   : > { %v928_v41 = vpop.xlane.xlu2 %927 }
 0x253   : > { %v929_v43 = vsub.f32 %v924_v22, %v928_v41 }
 0x255   : > { %v930_v44 = vmul.f32 1.442695, %v929_v43  ;;  %v1273_v43 = vld [vmem:[%s2435_s6 + $0x30] sm:$0xff] }
 0x265   : > { %v863_v27 = vpop.xlane.xlu0 %862 }
 0x266   : > { %v864_v28 = vsub.f32 %v859_v25, %v863_v27  ;;  %v2108_v27 = vmov 32.0  }
 0x268   : > { %v865_v29 = vmul.f32 1.442695, %v864_v28 }
 0x26a   : > { %1788 = vpow2.f32 %v865_v29 }
 0x270   : > { %v1789_v30 = vpop.eup %1788 }
 0x271   : > { %v867_v31 = vsel %vm835_vm2, %v1789_v30, 0.0 }
 0x272   : > { %868 = vadd.xlane.f32.xlu1 %v867_v31 }
 0x28b   : > { %872 = vrot.lane.b32.xlu1 %v2455_v8, %s2103_s1  ;;  %s2705_s1 = sld [smem:[#allocation47_spill]] }
 0x291   : > { %s1980_s9 = scalar_lea.hbm %s2705_s1, 16 }
 0x293   : > { %1009 = vrot.lane.b32.xlu1 %v828_v9, %s2104_s26 }
 0x2e5   : > { %v869_v32 = vpop.xlane.xlu1 %868 }
 0x2e6   : > { %1790 = vrcp.f32 %v869_v32 }
 0x2e7   : > { %1792 = vpow2.f32 %v930_v44 }
 0x2ec   : > { %v1791_v33 = vpop.eup %1790 }
 0x2ed   : > { %v871_v35 = vmul.f32 %v1791_v33, %v1789_v30  ;;  %v1793_v51 = vpop.eup %1792  ;;  %v1237_v33 = vld [vmem:[%s2425_s21 + $0x10] sm:$0xff] }
 0x2ee   : > { %v932_v52 = vsel %vm835_vm2, %v1793_v51, 0.0 }
 0x2fd   : > { %v873_v34 = vpop.permute.xlu1 %872 }
 0x2fe   : > { %893 = vmatpush.msra.mxu2 %v873_v34 }
 0x2ff   : > { %1621 = vmatmul.msk.f32.vlgmr.msra.gmra.mxu2 %vm835_vm2, %v871_v35  ;;  %v1236_v35 = vld [vmem:[%s2425_s21 + $0x8] sm:$0xff] }
 0x305   : > { %v1010_v36 = vpop.permute.xlu1 %1009 }
 0x306   : > { %1628 = vmatmul.msk.f32.vlgmr.msra.gmra.mxu0 %vm835_vm2, %v1010_v36 }
 0x382   : > { %v895_v37 = vpop.f32.mrf.mxu2 }
 0x383   : > { %1626 = vmatmul.msk.f32.vlgmr.msra.gmra.mxu3 %vm835_vm2, %v895_v37  ;;  %v1034_v38 = vpop.f32.mrf.mxu0  ;;  %v1235_v37 = vld [vmem:[%s2425_s21] sm:$0xff] }
 0x384   : > { %v1035_v39 = vadd.f32 %v1034_v38, %v830_v20 }
 0x386   : > { %v1037_v40 = vsel %vm835_vm2, %v1035_v39, -inf }
 0x387   : > { %1038 = vmax.xlane.f32.xlu1 %v1037_v40 }
 0x38b   : > { %1632 = vmatmul.msk.f32.vlgmr.msrb.gmra.mxu3 %vm835_vm2, %v1099_v15 }
 0x3a0   : > { %1048 = vrot.lane.b32.xlu1 %v2455_v8, %s2105_s11  ;;  %s2706_s11 = sld [smem:[#allocation26_spill]] }
 0x3a6   : > { %p2707_p9 = scmp.ne.s32.totalorder %s2706_s11, 0 }
 0x3fa   : > { %v1039_v45 = vpop.xlane.xlu1 %1038 }
 0x3fb   : > { %v1040_v48 = vsub.f32 %v1035_v39, %v1039_v45  ;;  %v1272_v45 = vld [vmem:[%s2435_s6 + $0x28] sm:$0xff] }
 0x3fd   : > { %v1041_v50 = vmul.f32 1.442695, %v1040_v48 }
 0x3ff   : > { %1794 = vpow2.f32 %v1041_v50 }
 0x405   : > { %v1795_v53 = vpop.eup %1794 }
 0x406   : > { %v2481_v42 = vpop.f32.mrf.mxu3  ;;  %v1043_v54 = vsel %vm835_vm2, %v1795_v53, 0.0 }
 0x40e   : > { %v1123_v46 = vpop.f32.mrf.mxu3 }
 0x40f   : > { %v1124_v47 = vadd.f32 %v1123_v46, %v830_v20 }
 0x411   : > { %v1126_v49 = vsel %vm835_vm2, %v1124_v47, -inf }
 0x412   : > { %1127 = vmax.xlane.f32.xlu0 %v1126_v49  ;;  %v1049_v1 = vpop.permute.xlu1 %1048  ;;  %v1270_v49 = vld [vmem:[%s2435_s6 + $0x18] sm:$0xff] }
 0x41a   : > { %933 = vadd.xlane.f32.xlu0 %v932_v52 }
 0x422   : > { %1044 = vadd.xlane.f32.xlu0 %v1043_v54 }
 0x436   : > { %937 = vrot.lane.b32.xlu0 %v2455_v8, %s2106_s3  ;;  %s1353_s3 = sshll.u32 %s2446_s22, 4  ;;  %s1354_s3 = int_to_ptr.vmem [resolvable:$true] %s1353_s3 }
 0x485   : > { %v1128_v55 = vpop.xlane.xlu0 %1127 }
 0x486   : > { %v1129_v56 = vsub.f32 %v1124_v47, %v1128_v55  ;;  %v1271_v47 = vld [vmem:[%s2435_s6 + $0x20] sm:$0xff] }
 0x488   : > { %v1130_v57 = vmul.f32 1.442695, %v1129_v56 }
 0x48a   : > { %1796 = vpow2.f32 %v1130_v57  ;;  %v1782_v57 = vld [vmem:[%s2699_s4] ss:$0 sm:$0xff] }
 0x48d   : > { %v934_v60 = vpop.xlane.xlu0 %933 }
 0x48e   : > { %1798 = vrcp.f32 %v934_v60  ;;  %v1783_v60 = vld [vmem:[%s2700_s0] ss:$0 sm:$0xff] }
 0x490   : > { %v1797_v58 = vpop.eup %1796 }
 0x491   : > { %v1132_v59 = vsel %vm835_vm2, %v1797_v58, 0.0 }
 0x492   : > { %1133 = vadd.xlane.f32.xlu2 %v1132_v59 }
 0x494   : > { %v1799_v62 = vpop.eup %1798 }
 0x495   : > { %v1045_v61 = vpop.xlane.xlu0 %1044  ;;  %v936_v0 = vmul.f32 %v1799_v62, %v1793_v51 }
 0x496   : > { %1800 = vrcp.f32 %v1045_v61 }
 0x49c   : > { %v1801_v2 = vpop.eup %1800 }
 0x49d   : > { %v1047_v3 = vmul.f32 %v1801_v2, %v1795_v53  ;;  %v1784_v2 = vld [vmem:[%s769_s17] ss:$0 sm:$0xff]  ;;  %s2703_s17 = sld [smem:[#allocation23_spill]] }
 0x4a8   : > { %v938_v63 = vpop.permute.xlu0 %937 }
 0x4a9   : > { %958 = vmatpush.msrb.mxu2 %v938_v63  ;;  %v1269_v63 = vld [vmem:[%s2435_s6 + $0x10] sm:$0xff] }
 0x4aa   : > { %1137 = vrot.lane.b32.xlu2 %v2455_v8, %s2107_s16  ;;  %1624 = vmatmul.msk.f32.vlgmr.msrb.gmra.mxu2 %vm835_vm2, %v936_v0  ;;  %v826_v8 = vld [vmem:[%s2416_s8 + $0x10] sm:$0xff]  ;;  %v1268_v0 = vld [vmem:[%s2435_s6 + $0x8] sm:$0xff] }
 0x4ab   : > { %1069 = vmatpush.msra.mxu2 %v1049_v1  ;;  %1092 = vmatpush.msra.mxu1 %v826_v8  ;;  %v1267_v1 = vld [vmem:[%s2435_s6] sm:$0xff] }
 0x4ad   : > { %1181 = vmatpush.msrb.mxu2 %v827_v13 }
 0x4b2   : > { %1629 = vmatmul.msk.f32.vlgmr.msra.gmra.mxu2 %vm835_vm2, %v1047_v3 }
 0x505   : > { %v1134_v4 = vpop.xlane.xlu2 %1133 }
 0x506   : > { %1802 = vrcp.f32 %v1134_v4 }
 0x507   : > { %1804 = vrcp.f32 %v2108_v27 }
 0x50c   : > { %v1803_v6 = vpop.eup %1802 }
 0x50d   : > { %v1136_v7 = vmul.f32 %v1803_v6, %v1797_v58  ;;  %v1138_v9 = vpop.permute.xlu2 %1137  ;;  %v1805_v28 = vpop.eup %1804 }
 0x50e   : > { %1158 = vmatpush.msrb.mxu0 %v1138_v9  ;;  %v1199_v29 = vmul.f32 32.0, %v1805_v28  ;;  %vm1203_vm4 = vweird.f32 %v1805_v28 }
 0x50f   : > { %1633 = vmatmul.msk.f32.vlgmr.msrb.gmra.mxu0 %vm835_vm2, %v1136_v7  ;;  %v1785_v7 = vld [vmem:[%s777_s20] ss:$0 sm:$0xff] }
 0x510   : > { %v1200_v30 = vsub.f32 1.0, %v1199_v29  ;;  %v1786_v29 = vld [vmem:[%s780_s5] ss:$0 sm:$0xff] }
 0x512   : > { %v1201_v31 = vmul.f32 %v1805_v28, %v1200_v30 }
 0x514   : > { %v1202_v32 = vadd.f32 %v1805_v28, %v1201_v31 }
 0x516   : > { %v2506_v34 = vsel %vm1203_vm4, %v1805_v28, %v1202_v32  ;;  %v1787_v32 = vld [vmem:[%s649_s13] ss:$0 sm:$0xff] }
 0x52d   : > { %v960_v11 = vpop.f32.mrf.mxu2 }
 0x52e   : > { %1625 = vmatmul.msk.f32.vlgmr.msrb.gmra.mxu1 %vm835_vm2, %v960_v11 }
 0x535   : > { %v1071_v12 = vpop.f32.mrf.mxu2 }
 0x536   : > { %1630 = vmatmul.msk.f32.vlgmr.msra.gmra.mxu1 %vm835_vm2, %v1071_v12 }
 0x58c   : > { %v1160_v14 = vpop.f32.mrf.mxu0 }
 0x58d   : > { %1634 = vmatmul.msk.f32.vlgmr.msrb.gmra.mxu2 %vm835_vm2, %v1160_v14 }
 0x5ab   : > { %v983_v15 = vpop.f32.mrf.mxu1 }
 0x5ac   : > { %v1007_v17 = vadd.f32 %v2481_v42, %v983_v15  ;;  %v1274_v42 = vld [vmem:[%s2435_s6 + $0x38] sm:$0xff]  ;;  %s1638_s6 = sshll.u32 %s2703_s17, 3 }
 0x5ad   : > { %1291 = vmatpush.msra.mxu3 %v1274_v42  ;;  %s1351_s26 = scalar_lea.hbm %s2705_s1, %s1638_s6 }
 0x5ae   : > { %s1355_s16 = sshll.u32 %s1351_s26, 4  ;;  %s1356_s16 = int_to_ptr.hbm [resolvable:$true] %s1355_s16 }
 0x5af   : > { %1292 = vmatpush.msra.mxu3 %v1273_v43  ;;  %s1974_s10 = sshra.s32 %s1356_s16, 4  ;;  %s1975_s10 = int_to_ptr.hbm [resolvable:$true] %s1974_s10 }
 0x5b0   : > { %s1976_s5 = scalar_lea.hbm %s1975_s10, 8  ;;  %p1981_p0 = scmp.lt.s32.totalorder %s1975_s10, %s2705_s1 }
 0x5b1   : > { %1293 = vmatpush.msra.mxu3 %v1272_v45  ;;  %p1977_p8 = scmp.ne.s32.totalorder %s1975_s10, %s1976_s5  ;;  %p1982_p2 = scmp.lt.s32.totalorder %s1980_s9, %s1976_s5 }
 0x5b3   : > { %v1094_v16 = vpop.f32.mrf.mxu1  ;;  %1294 = vmatpush.msra.mxu3 %v1271_v47  ;;  %p1978_p10 = pnand %p1977_p8, %p2707_p9  ;;  %p1983_p4 = por %p1982_p2, %p1981_p0 }
 0x5b4   : > { %v1097_v18 = vadd.f32 %v1094_v16, %v1007_v17 }
 0x5b5   : > { %1295 = vmatpush.msra.mxu3 %v1270_v49  ;;  %p1979_p11 = pneg %p1978_p10 }
 0x5b7   : > { %1296 = vmatpush.msra.mxu3 %v1269_v63  ;;  %p1984_p5 = pnand %p1983_p4, %p1979_p11 }
 0x5b9   : > { %1297 = vmatpush.msra.mxu3 %v1268_v0 }
 0x5bb   : > { %1298 = vmatpush.msra.mxu3 %v1267_v1 }
 0x610   : > { %v1183_v20 = vpop.f32.mrf.mxu2 }
 0x611   : > { %v1186_v21 = vadd.f32 %v1183_v20, %v1097_v18 }
 0x613   : > { %v1191_v22 = vadd.f32 %v1781_v19, %v1186_v21 }
 0x615   : > { %v1192_v23 = vadd.f32 %v1191_v22, %v2451_v5  ;;  %v1238_v5 = vld [vmem:[%s2425_s21 + $0x18] sm:$0xff] }
 0x616   : > { %1258 = vmatpush.msrb.mxu1 %v1238_v5 }
 0x617   : > { %v1195_v24 = vsel %vm800_vm1, %v1192_v23, 0.0  ;;  %v1206_v25 = vmul.f32 %v1192_v23, %v1192_v23 }
 0x618   : > { %1196 = vadd.xlane.f32.xlu0 %v1195_v24  ;;  %1259 = vmatpush.msrb.mxu1 %v1237_v33 }
 0x619   : > { %v1207_v26 = vsel %vm800_vm1, %v1206_v25, 0.0 }
 0x61a   : > { %1208 = vadd.xlane.f32.xlu1 %v1207_v26  ;;  %1260 = vmatpush.msrb.mxu1 %v1236_v35 }
 0x61c   : > { %1261 = vmatpush.msrb.mxu1 %v1235_v37 }
 0x68b   : > { %v1197_v36 = vpop.xlane.xlu0 %1196 }
 0x68c   : > { %v1205_v38 = vmul.f32 %v2506_v34, %v1197_v36 }
 0x68d   : > { %v1209_v39 = vpop.xlane.xlu1 %1208 }
 0x68e   : > { %v1211_v40 = vmul.f32 %v1205_v38, %v1205_v38  ;;  %v1210_v41 = vmul.f32 %v1209_v39, %v2506_v34  ;;  %v1214_v56 = vsub.f32 %v1192_v23, %v1205_v38 }
 0x690   : > { %v1212_v44 = vsub.f32 %v1210_v41, %v1211_v40 }
 0x692   : > { %v1213_v46 = vmax.f32 %v1212_v44, 0.0 }
 0x694   : > { %v1215_v48 = vadd.f32 1e-12, %v1213_v46 }
 0x696   : > { %1806 = vrsqrt.f32 %v1215_v48  ;;  %vm1222_vm6 = vweird.f32 %v1215_v48 }
 0x69c   : > { %v1807_v50 = vpop.eup %1806 }
 0x69d   : > { %v1217_v51 = vmul.f32 %v1807_v50, %v1215_v48  ;;  %vm1223_vm5 = vweird.f32 %v1807_v50 }
 0x69e   : > { %vm1224_vm7 = vmor %vm1222_vm6, %vm1223_vm5 }
 0x69f   : > { %v1218_v52 = vmul.f32 %v1807_v50, %v1217_v51 }
 0x6a1   : > { %v1219_v53 = vmul.f32 0.5, %v1218_v52 }
 0x6a3   : > { %v1220_v54 = vsub.f32 1.5, %v1219_v53 }
 0x6a5   : > { %v1221_v55 = vmul.f32 %v1807_v50, %v1220_v54 }
 0x6a7   : > { %v1225_v58 = vsel %vm1224_vm7, %v1807_v50, %v1221_v55 }
 0x6a8   : > { %v1226_v59 = vmul.f32 %v1225_v58, %v1214_v56 }
 0x6aa   : > { %v1230_v61 = vmul.f32 %v1782_v57, %v1226_v59 }
 0x6ac   : > { %v1234_v62 = vadd.f32 %v1783_v60, %v1230_v61 }
 0x6ae   : > { %1635 = vmatmul.msk.f32.vlgmr.msrb.gmra.mxu1 %vm800_vm1, %v1234_v62 }
 0x72b   : > { %v1263_v3 = vpop.f32.mrf.mxu1 }
 0x72c   : > { %v1264_v4 = vadd.f32 %v1784_v2, %v1263_v3 }
 0x72e   : > { %v1266_v6 = vmax.f32 %v1264_v4, 0.0 }
 0x730   : > { %1636 = vmatmul.msk.f32.vlgmr.msra.gmra.mxu3 %vm1279_vm8, %v1266_v6 }
 0x7b3   : > { %v1300_v9 = vpop.f32.mrf.mxu3 }
 0x7b4   : > { %v1301_v10 = vadd.f32 %v1785_v7, %v1300_v9 }
 0x7b6   : > { %v1303_v8 = vadd.f32 %v1301_v10, %v1234_v62 }
 0x7b8   : > { %v1306_v11 = vsel %vm800_vm1, %v1303_v8, 0.0  ;;  %v1310_v12 = vmul.f32 %v1303_v8, %v1303_v8 }
 0x7b9   : > { %1307 = vadd.xlane.f32.xlu2 %v1306_v11 }
 0x7ba   : > { %v1311_v13 = vsel %vm800_vm1, %v1310_v12, 0.0 }
 0x7bb   : > { %1312 = vadd.xlane.f32.xlu0 %v1311_v13 }
 0x82c   : > { %v1308_v14 = vpop.xlane.xlu2 %1307 }
 0x82d   : > { %v1309_v15 = vmul.f32 %v1308_v14, %v2506_v34 }
 0x82e   : > { %v1313_v16 = vpop.xlane.xlu0 %1312 }
 0x82f   : > { %v1315_v17 = vmul.f32 %v1309_v15, %v1309_v15  ;;  %v1314_v18 = vmul.f32 %v1313_v16, %v2506_v34  ;;  %v1318_v28 = vsub.f32 %v1303_v8, %v1309_v15 }
 0x831   : > { %v1316_v19 = vsub.f32 %v1314_v18, %v1315_v17 }
 0x833   : > { %v1317_v20 = vmax.f32 %v1316_v19, 0.0 }
 0x835   : > { %v1319_v21 = vadd.f32 1e-12, %v1317_v20 }
 0x837   : > { %1808 = vrsqrt.f32 %v1319_v21  ;;  %vm1326_vm10 = vweird.f32 %v1319_v21 }
 0x83d   : > { %v1809_v22 = vpop.eup %1808 }
 0x83e   : > { %v1321_v23 = vmul.f32 %v1809_v22, %v1319_v21  ;;  %vm1327_vm9 = vweird.f32 %v1809_v22 }
 0x83f   : > { %vm1328_vm11 = vmor %vm1326_vm10, %vm1327_vm9 }
 0x840   : > { %v1322_v24 = vmul.f32 %v1809_v22, %v1321_v23 }
 0x842   : > { %v1323_v25 = vmul.f32 0.5, %v1322_v24 }
 0x844   : > { %v1324_v26 = vsub.f32 1.5, %v1323_v25 }
 0x846   : > { %v1325_v27 = vmul.f32 %v1809_v22, %v1324_v26 }
 0x848   : > { %v1329_v30 = vsel %vm1328_vm11, %v1809_v22, %v1325_v27 }
 0x849   : > { %v1330_v31 = vmul.f32 %v1329_v30, %v1318_v28 }
 0x84b   : > { %v1334_v5 = vmul.f32 %v1786_v29, %v1330_v31 }
 0x84d   : > { %v1338_v33 = vadd.f32 %v1787_v32, %v1334_v5 }
 0x84f   : > { %1339 = vst.msk [vmem:[%s2446_s22] sm:$0xff] %vm800_vm1, %v1338_v33 }
 0x850   : > { %1987 = shalt.err (!%p1984_p5)
}
 0x851   : > { %1655 = dma.vmem_to_hbm [thread:$0]  (%p2707_p9), %s1354_s3, 128, %s1356_s16, %s1341_s27  }
 0x852 PF: > { %s2708_s2 = sld [smem:[#allocation19_spill]]  ;;  %p1678_p7 = scmp.ge.s32.totalorder %s2094_s23, 2 }
 0x853   : > { %s2709_s22 = sld [smem:[#allocation27_spill]] }
 0x858   : > { %s1367_s4 = sand.u32 1, %s2708_s2  }
 0x859   : > { %p2710_p12 = scmp.ne.s32.totalorder %s2709_s22, 0  ;;  %s1368_s0 = scalar_lea.sflag [#allocation4], %s1367_s4 }
 0x85b   : > { %p1674_p13 = pnand %p1678_p7, %p2710_p12 }
 0x85d   : > { %p1675_p1 = pneg %p1674_p13 }
 0x85f   : > { %2049 = dma.done.wait (%p1675_p1), %s1368_s0, 128  }
 0x860   : > { %2051 = vsyncadd (%p1675_p1), %s1368_s0, 4294967168  ;;  %s36_s23 = sadd.s32 1, %s2094_s23   ;;  %s2711_s29 = sld [smem:[#allocation17_spill]] }
 0x861   : > { %p33_p3 = scmp.ge.s32.totalorder %s36_s23, 6   ;;  %s2712_s30 = sld [smem:[#allocation18_spill]] }
 0x862   : > { %s2713_s15 = sld [smem:[#allocation31_spill]] }
 0x863   : > { %s2714_s16 = sld [smem:[#allocation20_spill]] }
 0x864   : > { %s2715_s17 = sld [smem:[#allocation21_spill]] }
 0x865   : > { %s2716_s18 = sld [smem:[#allocation32_spill]]  ;;  %35 = sbr.rel (!%p33_p3) target bundleno = 29 (0x1d), region = 200 }
 0x866   : > { %s2717_s19 = sld [smem:[#allocation24_spill]] }
 0x867   : > { %s2718_s20 = sld [smem:[#allocation25_spill]] }
 0x868   : > { %s2719_s21 = sld [smem:[#allocation28_spill]] }
 0x869   : > { %s2720_s22 = sld [smem:[#allocation30_spill]] }
 0x86a   :  { %1374 = vsyncpa [#allocation3], 1 }
 0x86b   :  { %1376 = vsyncpa [#allocation3 + $0x1], 1 }
 0x86c   :  { %1377 = vsyncpa [#allocation6], 1 }
 0x86d   :  { %1379 = vsyncpa [#allocation6 + $0x1], 1 }
 0x86e   :  { %1380 = vsyncpa [#allocation9], 1 }
 0x86f   :  { %1382 = vsyncpa [#allocation9 + $0x1], 1 }
 0x870   :  { %1383 = vsyncpa [#allocation4], 1 }
 0x871   :  { %1385 = vsyncpa [#allocation4 + $0x1], 1 }

</bundles_post_ra>
